<compile_context>
chip_gen: v5e
topology: v5e:2x2
jax: 0.10.0
libtpu: 0.0.40
codegen_flags: <defaults>
</compile_context>

<pallas_src>
import functools

import jax
import jax.numpy as jnp
from jax.experimental import pallas as pl
from jax.experimental.pallas import tpu as pltpu


def _round_up(x: int, m: int) -> int:
    return (x + m - 1) // m * m


_VMEM_BUDGET_BYTES = 40 * 1024 * 1024  # target for double-buffered tile footprint
_VMEM_LIMIT_BYTES = 48 * 1024 * 1024   # < v7x's 64 MiB physical; > v5e's 16 MiB default


# ---------------------------------------------------------------------------
# Kernels
# ---------------------------------------------------------------------------
def _linear_kernel_single_k(x_ref, w_ref, b_ref, o_ref):
    """Whole K reduction in one MXU dot: o = x @ w + b (f32 accumulation)."""
    o_ref[...] = (
        jnp.dot(x_ref[...], w_ref[...], preferred_element_type=jnp.float32)
        + b_ref[...]
    ).astype(o_ref.dtype)


def _linear_kernel_tiled_k(x_ref, w_ref, b_ref, o_ref):
    """K tiled along grid axis 2; accumulate directly into the resident f32 output."""

    @pl.when(pl.program_id(2) == 0)
    def _init():
        o_ref[...] = jnp.broadcast_to(b_ref[...], o_ref.shape)

    o_ref[...] += jnp.dot(
        x_ref[...], w_ref[...], preferred_element_type=jnp.float32
    )


# ---------------------------------------------------------------------------
# One-time parameter staging (hoisted out of the per-call path)
# ---------------------------------------------------------------------------
def prepare_linear_params(weight, bias, *, compute_dtype=jnp.bfloat16, tn_cap=512):
    """Transpose, zero-pad to lane-dense shapes, and cast the weights once."""
    N, K = weight.shape
    assert bias.shape == (N,)
    Kp = _round_up(K, 128)
    tn = min(tn_cap, _round_up(N, 128))
    Np = _round_up(N, tn)
    wp = (
        jnp.zeros((Kp, Np), compute_dtype)
        .at[:K, :N]
        .set(weight.T.astype(compute_dtype))
    )
    bp = jnp.zeros((1, Np), jnp.float32).at[0, :N].set(bias.astype(jnp.float32))
    return {
        "wp": wp, "bp": bp, "weight": weight, "bias": bias,
        "N": N, "K": K, "tn": tn, "compute_dtype": compute_dtype,
    }


# ---------------------------------------------------------------------------
# Forward
# ---------------------------------------------------------------------------
def linear_forward(x, params, *, force_pallas=False):
    """nn.Linear semantics: x (..., K) f32 -> (..., N) f32."""
    N, K = params["N"], params["K"]
    compute_dtype = params["compute_dtype"]
    *lead, K_in = x.shape
    assert K_in == K

    x2d = x.reshape(-1, K)
    M = x2d.shape[0]

    # Small-problem fast path: padding + pallas_call fixed overhead dominate; XLA wins.
    if not force_pallas and M * N * K < 256 * 128 * 256:
        out = x2d.astype(jnp.float32) @ params["weight"].T + params["bias"]
        return out.reshape(*lead, N)

    wp, bp, tn = params["wp"], params["bp"], params["tn"]
    Kp, Np = wp.shape
    itemsize = jnp.dtype(compute_dtype).itemsize

    # --- tile selection ----------------------------------------------------
    Mp8 = _round_up(max(M, 8), 8)
    tm = min(512, Mp8)
    # v7x megacore: ensure >= 2 M-tiles when possible so both TensorCores get work
    # (nb_class pads to a single 128-wide j tile, so N can't be split).
    if Mp8 > 8 and Mp8 // tm < 2:
        tm = _round_up(pl.cdiv(Mp8, 2), 8)

    def vmem_bytes(tm_, tn_, tk_):
        # double-buffered bf16 inputs + double-buffered f32 output tile + bias
        return (2 * (tm_ * tk_ + tk_ * tn_) * itemsize
                + 2 * tm_ * tn_ * 4 + 2 * tn_ * 4)

    # Collapse the K reduction into a single MXU dot whenever the tiles fit VMEM.
    tk = Kp
    if vmem_bytes(tm, tn, tk) > _VMEM_BUDGET_BYTES:
        tk = 128  # always divides Kp
        for cand in (2048, 1024, 512, 256):
            if cand <= Kp and Kp % cand == 0 and vmem_bytes(tm, tn, cand) <= _VMEM_BUDGET_BYTES:
                tk = cand
                break
    while vmem_bytes(tm, tn, tk) > _VMEM_BUDGET_BYTES and tm > 8:
        tm = max(8, _round_up(tm // 2, 8))

    Mp = _round_up(M, tm)

    # --- x staging: cast only (no pad copy) when already tile-aligned -------
    if M == Mp and K == Kp:
        xp = x2d.astype(compute_dtype)
    else:
        xp = (
            jnp.zeros((Mp, Kp), compute_dtype)
            .at[:M, :K]
            .set(x2d.astype(compute_dtype))
        )

    cost = pl.CostEstimate(
        flops=2 * Mp * Kp * Np,
        transcendentals=0,
        bytes_accessed=(Mp * Kp + Kp * Np) * itemsize + Mp * Np * 4 + Np * 4,
    )

    if tk == Kp:
        # 2-D grid: no reduction axis, no accumulator scratch, no pl.when.
        out = pl.pallas_call(
            _linear_kernel_single_k,
            out_shape=jax.ShapeDtypeStruct((Mp, Np), jnp.float32),
            grid_spec=pltpu.PrefetchScalarGridSpec(
                num_scalar_prefetch=0,
                grid=(Mp // tm, Np // tn),
                in_specs=[
                    pl.BlockSpec((tm, Kp), lambda i, j: (i, 0)),
                    pl.BlockSpec((Kp, tn), lambda i, j: (0, j)),
                    pl.BlockSpec((1, tn), lambda i, j: (0, j)),
                ],
                out_specs=pl.BlockSpec((tm, tn), lambda i, j: (i, j)),
            ),
            compiler_params=pltpu.CompilerParams(
                dimension_semantics=("parallel", "parallel"),
                vmem_limit_bytes=_VMEM_LIMIT_BYTES,
            ),
            cost_estimate=cost,
        )(xp, wp, bp)
    else:
        # 3-D grid: K reduction last + "arbitrary"; accumulate into resident f32 output.
        out = pl.pallas_call(
            _linear_kernel_tiled_k,
            out_shape=jax.ShapeDtypeStruct((Mp, Np), jnp.float32),
            grid_spec=pltpu.PrefetchScalarGridSpec(
                num_scalar_prefetch=0,
                grid=(Mp // tm, Np // tn, Kp // tk),
                in_specs=[
                    pl.BlockSpec((tm, tk), lambda i, j, k: (i, k)),
                    pl.BlockSpec((tk, tn), lambda i, j, k: (k, j)),
                    pl.BlockSpec((1, tn), lambda i, j, k: (0, j)),
                ],
                out_specs=pl.BlockSpec((tm, tn), lambda i, j, k: (i, j)),
            ),
            compiler_params=pltpu.CompilerParams(
                dimension_semantics=("parallel", "parallel", "arbitrary"),
                vmem_limit_bytes=_VMEM_LIMIT_BYTES,
            ),
            cost_estimate=cost,
        )(xp, wp, bp)

    return out[:M, :N].reshape(*lead, N)


if __name__ == "__main__":
    # Config implied by the module: in_features = 2 * hidden_dim, out = nb_class.
    hidden_dim = 64
    in_features = 2 * hidden_dim  # K = 128 (lane-aligned -> no per-call x pad copy)
    nb_class = 10
    batch, seq = 2, 8             # leading dims flattened -> M = 16 (two 8-row M tiles)

    key = jax.random.PRNGKey(0)
    k_x, k_w, k_b = jax.random.split(key, 3)

    # Parameter init mimicking the PyTorch module:
    #   weight: kaiming_normal_(a=1, mode='fan_in') -> std = 1/sqrt(fan_in)
    #   bias:   normal_(mean=0, std=1)
    w_std = 1.0 / jnp.sqrt(jnp.float32(in_features))
    weight = jax.random.normal(k_w, (nb_class, in_features), jnp.float32) * w_std
    bias = jax.random.normal(k_b, (nb_class,), jnp.float32)
    x = jax.random.normal(k_x, (batch, seq, in_features), jnp.float32)

    # One-time parameter staging (transpose/pad/cast hoisted off the call path).
    params = prepare_linear_params(weight, bias)
    fwd = jax.jit(
        functools.partial(linear_forward, params=params, force_pallas=True)
    )

    logits = fwd(x)
    jax.block_until_ready(logits)
    assert logits.shape == (batch, seq, nb_class)

    # Reference (true f32 nn.Linear semantics); tolerance accounts for bf16 operands.
    ref = x @ weight.T + bias
    max_err = float(jnp.max(jnp.abs(logits - ref)))
    assert jnp.allclose(logits, ref, atol=3e-2, rtol=3e-2), max_err

    # TODO(synk): the PyTorch `.to(device)` is a host/device placement no-op in JAX.
    print("KERNEL_OK")
</pallas_src>

<mosaic_0001>
module attributes {stable_mosaic.version = 11 : i64} {
  func.func @_linear_kernel_single_k(%arg0: i32, %arg1: i32, %arg2: memref<8x128xbf16, #tpu.memory_space<vmem>>, %arg3: memref<128x128xbf16, #tpu.memory_space<vmem>>, %arg4: memref<1x128xf32, #tpu.memory_space<vmem>>, %arg5: memref<8x128xf32, #tpu.memory_space<vmem>>) attributes {dimension_semantics = [#tpu.dimension_semantics<parallel>, #tpu.dimension_semantics<parallel>], iteration_bounds = array<i64: 2, 1>, scalar_prefetch = 0 : i64, scratch_operands = 0 : i64, tpu.core_type = #tpu.core_type<tc>, window_params = [{transform_indices = @transform_0, window_bounds = array<i64: 8, 128>}, {transform_indices = @transform_1, window_bounds = array<i64: 128, 128>}, {transform_indices = @transform_2, window_bounds = array<i64: 1, 128>}, {transform_indices = @transform_3, window_bounds = array<i64: 8, 128>}]} {
    %c0 = arith.constant 0 : index
    %c0_0 = arith.constant 0 : index
    %0 = vector.load %arg2[%c0, %c0_0] : memref<8x128xbf16, #tpu.memory_space<vmem>>, vector<8x128xbf16>
    %c0_1 = arith.constant 0 : index
    %c0_2 = arith.constant 0 : index
    %1 = vector.load %arg3[%c0_1, %c0_2] : memref<128x128xbf16, #tpu.memory_space<vmem>>, vector<128x128xbf16>
    %cst = arith.constant dense<0.000000e+00> : vector<8x128xf32>
    %2 = tpu.matmul %0, %1, %cst {dimension_numbers = #tpu.dot_dimension_numbers<[1], [0], [0], [1], [0, 0, 1, 1], [], []>} : vector<8x128xbf16>, vector<128x128xbf16>, vector<8x128xf32> -> vector<8x128xf32>
    %c0_3 = arith.constant 0 : index
    %c0_4 = arith.constant 0 : index
    %3 = vector.load %arg4[%c0_3, %c0_4] : memref<1x128xf32, #tpu.memory_space<vmem>>, vector<1x128xf32>
    %4 = vector.broadcast %3 : vector<1x128xf32> to vector<8x128xf32>
    %5 = arith.addf %2, %4 : vector<8x128xf32>
    %c0_5 = arith.constant 0 : index
    %c0_6 = arith.constant 0 : index
    %6 = vector.load %arg5[%c0_5, %c0_6] : memref<8x128xf32, #tpu.memory_space<vmem>>, vector<8x128xf32>
    tpu.vector_store %arg5[%c0_5, %c0_6], %5 {strides = array<i32>} : memref<8x128xf32, #tpu.memory_space<vmem>>, vector<8x128xf32>,
    return
  }
  func.func @transform_0(%arg0: i32, %arg1: i32) -> (i32, i32) {
    %c0_i32 = arith.constant 0 : i32
    %c0_i32_0 = arith.constant 0 : i32
    return %arg0, %c0_i32 : i32, i32
  }
  func.func @transform_1(%arg0: i32, %arg1: i32) -> (i32, i32) {
    %c0_i32 = arith.constant 0 : i32
    %c0_i32_0 = arith.constant 0 : i32
    return %c0_i32, %arg1 : i32, i32
  }
  func.func @transform_2(%arg0: i32, %arg1: i32) -> (i32, i32) {
    %c0_i32 = arith.constant 0 : i32
    %c0_i32_0 = arith.constant 0 : i32
    return %c0_i32, %arg1 : i32, i32
  }
  func.func @transform_3(%arg0: i32, %arg1: i32) -> (i32, i32) {
    %c0_i32 = arith.constant 0 : i32
    return %arg0, %arg1 : i32, i32
  }
}

</mosaic_0001>

<bundles_post_ra>
// kernel: linear_forward.1
= control target key start
LH: loop header
LB: loop body
LE: loop exit
PB: predicated region body
PF: predicated region fallthrough
CT: control target
= control target key end

     0   :  { %8 = vsyncpa [#allocation3], 0  ;;  %s576_s12 = smov 0   ;;  %s578_s13 = smov 0   ;;  %s620_s0 = inlined_call_operand.vmem [shape: bf16[16,128], index: 0, kind: input, shape index: {}]   ;;  %s621_s1 = inlined_call_operand.hbm [shape: bf16[128,128], index: 1, kind: input, shape index: {}]   ;;  %s622_s2 = inlined_call_operand.vmem [shape: f32[1,128], index: 2, kind: input, shape index: {}]   ;;  %s623_s3 = inlined_call_operand.vmem [shape: f32[16,128], index: 3, kind: output, shape index: {}]  }
   0x1   :  { %s580_s14 = smov 0  }
   0x2 LB: > { %s405_s15 = sadd.s32 4294967295, %s551_s14   ;;  %s26_s16 = sadd.s32 1, %s547_s13  ;;  %s551_s14 = sphi %s580_s14, %s14_s14   ;;  %s547_s13 = sphi %s578_s13, %s625_s13   ;;  %s543_s12 = sphi %s576_s12, %s624_s12  }
   0x3   : > { %p28_p0 = scmp.ge.s32.totalorder %s26_s16, 2  ;;  %p407_p1 = scmp.ge.s32.totalorder %s551_s14, 1 }
   0x4   : > { %p137_p2 = scmp.lt.s32.totalorder %s551_s14, 3  ;;  %p465_p4 = scmp.eq.s32.totalorder %s405_s15, 0 }
   0x5   : > { %s627_s16 = smov (%p28_p0, %s26_s16), 0  ;;  %s150_s19 = sshll.u32 %s621_s1, 4  ;;  %s151_s19 = int_to_ptr.hbm [resolvable:$true] %s150_s19 }
   0x6   : > { %p138_p3 = pnand %p407_p1, %p137_p2  ;;  %s553_s20 = smov [#allocation2]  }
   0x7   : > { %s152_s21 = sshll.u32 %s553_s20, 4  ;;  %s554_s22 = smov 64   ;;  %s153_s21 = int_to_ptr.vmem [resolvable:$true] %s152_s21 }
   0x8   : > { %p461_p5 = pneg %p138_p3  ;;  %s555_s23 = smov 4  }
   0x9   : > { %181 = sbr.rel (%p138_p3) target bundleno = 181 (0xb5), region = 32 }
   0xa   : > { %p462_p6 = pnand %p465_p4, %p461_p5 }
   0xc   : > { %464 = dma.hbm_to_vmem [thread:$0]  (!%p462_p6), %s151_s19, 1024, %s153_s21, [#allocation3], %s554_s22, %s554_s22, %s555_s23  }
   0xe   : > { %538 = dma.done.wait (%p465_p4), [#allocation3], 1024  }
   0xf   : > { %540 = vsyncadd (%p465_p4), [#allocation3], 4294966272  ;;  %v456_v0 = vld [vmem:[#allocation2 + $0x38] sm:$0xff]  ;;  %v455_v1 = vld [vmem:[#allocation2 + $0x30] sm:$0xff]  ;;  %p210_p7 = scmp.lt.s32.totalorder %s543_s12, 1 }
  0x10   : > { %293 = vmatpush.bf16.msra.mxu0 %v456_v0  ;;  %v454_v2 = vld [vmem:[#allocation2 + $0x28] sm:$0xff]  ;;  %v453_v3 = vld [vmem:[#allocation2 + $0x20] sm:$0xff]  ;;  %v452_v4 = vld [vmem:[#allocation2 + $0x18] sm:$0xff] }
  0x11   : > { %v451_v5 = vld [vmem:[#allocation2 + $0x10] sm:$0xff]  ;;  %s629_s12 = smov (!%p210_p7, %s543_s12), 1  ;;  %v450_v6 = vld [vmem:[#allocation2 + $0x8] sm:$0xff]  ;;  %v449_v7 = vld [vmem:[#allocation2] sm:$0xff] }
  0x12   : > { %s413_s24 = sshll.u32 %s629_s12, 2  ;;  %s414_s28 = sshll.u32 %s629_s12, 3  ;;  %v494_v9 = vld [vmem:[%s622_s2] ss:$0 sm:$0xff] }
  0x13   : > { %s213_s27 = scalar_lea.vmem %s620_s0, %s413_s24  ;;  %s223_s6 = scalar_lea.vmem %s623_s3, %s414_s28 }
  0x14   : > { %294 = vmatpush.bf16.msra.mxu0 %v455_v1  ;;  %v224_v8 = vld [vmem:[%s213_s27] sm:$0xf] }
  0x18   : > { %295 = vmatpush.bf16.msra.mxu0 %v454_v2 }
  0x1c   : > { %296 = vmatpush.bf16.msra.mxu0 %v453_v3 }
  0x20   : > { %297 = vmatpush.bf16.msra.mxu0 %v452_v4 }
  0x24   : > { %298 = vmatpush.bf16.msra.mxu0 %v451_v5 }
  0x28   : > { %299 = vmatpush.bf16.msra.mxu0 %v450_v6 }
  0x2c   : > { %300 = vmatpush.bf16.msra.mxu0 %v449_v7 }
  0x2f   : > { %301 = vmatmul.bf16.vlgmr.msra.gmra.mxu0 %v224_v8 }
  0xac   : > { %v302_v10 = vpop.f32.mrf.mxu0 }
  0xad   : > { %v303_v11 = vadd.f32 %v494_v9, %v302_v10 }
  0xaf   : > { %306 = vst [vmem:[%s223_s6] sm:$0xff] %v303_v11 }
  0xb4   : > { %v304_v12 = vpop.f32.mrf.mxu0 }
  0xb5 PF: > { %s14_s14 = sadd.s32 1, %s551_s14   ;;  %s624_s12 = smov %s547_s13 }
  0xb6   : > { %p11_p8 = scmp.ge.s32.totalorder %s14_s14, 4   ;;  %s625_s13 = smov %s627_s16 }
  0xb8   :  { %13 = sbr.rel (!%p11_p8) target bundleno = 2 (0x2), region = 71 }
  0xbd   :  { %332 = vsyncpa [#allocation3], 1 }
  0xbe   :  { %334 = vsyncpa [#allocation3 + $0x1], 1 }

</bundles_post_ra>
